<compile_context>
chip_gen: v6e
topology: v6e:2x2x1
jax: 0.10.0
libtpu: 0.0.40
codegen_flags: <defaults>
</compile_context>

<pallas_src>
import jax
import jax.numpy as jnp
from jax import lax
from jax.experimental import pallas as pl
from jax.experimental.pallas import tpu as pltpu


HIDDEN = 128
OUT_DIM = 7
BN_EPS = 1e-5
N_LAYERS = 4


def _bn_relu(y, gamma, beta):
    """BatchNorm1d (training-mode batch stats), affine folded, -> ReLU.

    The Linear bias that would precede BN is omitted by the caller: a bias
    added before BatchNorm is exactly cancelled by the mean subtraction.
    """
    mean = jnp.mean(y, axis=0, keepdims=True)
    var = jnp.mean(jnp.square(y - mean), axis=0, keepdims=True)  # biased var, as in BN training
    scale = gamma * lax.rsqrt(var + BN_EPS)
    shift = beta - mean * scale
    return jnp.maximum(y * scale + shift, 0.0)


def bc_vis_kernel(x_ref, z_ref, eps_ref, w1x_ref, w1z_ref, wh_ref,
                  whead_ref, bn_ref, hbias_ref, out_ref):
    bf16 = jnp.bfloat16
    f32 = jnp.float32

    bn = bn_ref[...]  # (2*N_LAYERS, 128): rows 0:4 = gamma(1..4), rows 4:8 = beta(1..4)

    # Layer 1: the first Linear split across the (x, z) halves of the input.
    y = (jnp.dot(x_ref[...].astype(bf16), w1x_ref[...], preferred_element_type=f32)
         + jnp.dot(z_ref[...].astype(bf16), w1z_ref[...], preferred_element_type=f32))
    h = _bn_relu(y, bn[0:1, :], bn[N_LAYERS:N_LAYERS + 1, :])

    # Layers 2..4: stacked weights, statically unrolled.
    for i in range(N_LAYERS - 1):
        y = jnp.dot(h.astype(bf16), wh_ref[i], preferred_element_type=f32)
        h = _bn_relu(y,
                     bn[i + 1:i + 2, :],
                     bn[N_LAYERS + i + 1:N_LAYERS + i + 2, :])

    # Fused mu/logvar head: (B,128) @ (128,256). Lanes 0:128 hold mu
    # (cols 0:OUT_DIM, rest exactly 0), lanes 128:256 hold logvar likewise.
    head = (jnp.dot(h.astype(bf16), whead_ref[...], preferred_element_type=f32)
            + hbias_ref[...])
    mu = head[:, :HIDDEN]        # lane-aligned slice
    logvar = head[:, HIDDEN:]    # lane-aligned slice

    # Reparameterization uses raw (pre-sigmoid) mu. eps is zero-padded past
    # column OUT_DIM, so padding lanes stay exactly zero (exp(0)*0 = 0).
    out = mu + jnp.exp(0.5 * logvar) * eps_ref[...]

    # Sigmoid only on the last real column (index OUT_DIM-1) of out and mu.
    col = lax.broadcasted_iota(jnp.int32, mu.shape, 1)
    last = col == (OUT_DIM - 1)
    mu_s = jnp.where(last, jax.nn.sigmoid(mu), mu)
    out_s = jnp.where(last, jax.nn.sigmoid(out), out)

    # Single lane-dense (B, 3*128) store; the wrapper slices out/mu/logvar.
    out_ref[...] = jnp.concatenate([out_s, mu_s, logvar], axis=1)


def init_params(key, in_dim):
    """Deterministic init matching weights_init_ (xavier uniform, zero bias)."""
    dims = [(in_dim, HIDDEN)] + [(HIDDEN, HIDDEN)] * 3
    params = {}
    keys = jax.random.split(key, 6)
    for i, (fan_in, fan_out) in enumerate(dims):
        bound = (6.0 / (fan_in + fan_out)) ** 0.5
        params[f"w{i+1}"] = jax.random.uniform(
            keys[i], (fan_in, fan_out), jnp.float32, -bound, bound)
        params[f"b{i+1}"] = jnp.zeros((1, fan_out), jnp.float32)   # pre-BN bias (cancelled)
        params[f"g{i+1}"] = jnp.ones((1, fan_out), jnp.float32)    # BN gamma
        params[f"bt{i+1}"] = jnp.zeros((1, fan_out), jnp.float32)  # BN beta
    bound = (6.0 / (HIDDEN + OUT_DIM)) ** 0.5
    for name, k in (("mu", keys[4]), ("lv", keys[5])):
        params[f"w{name}"] = jax.random.uniform(
            k, (HIDDEN, OUT_DIM), jnp.float32, -bound, bound)
        params[f"b{name}"] = jnp.zeros((1, OUT_DIM), jnp.float32)
    return params


def pack_params(params, x_dim):
    """Pack module parameters into a few kernel-ready arrays (done once).

    * Weights are pre-cast to bf16 (MXU-native); accumulation stays f32.
    * b1..b4 are dropped: a bias added right before BatchNorm is exactly
      cancelled by the mean subtraction (exact, not an approximation).
    * mu/logvar head weights fused into one (128, 256) matrix: mu block in
      lanes 0:128, logvar block in lanes 128:256 (zero-padded columns).
    """
    bf16 = jnp.bfloat16
    w1 = params["w1"]
    packed = {
        "w1x": w1[:x_dim].astype(bf16),
        "w1z": w1[x_dim:].astype(bf16),
        "w_hidden": jnp.stack(
            [params["w2"], params["w3"], params["w4"]]).astype(bf16),
    }
    w_head = jnp.zeros((HIDDEN, 2 * HIDDEN), jnp.float32)
    w_head = w_head.at[:, :OUT_DIM].set(params["wmu"])
    w_head = w_head.at[:, HIDDEN:HIDDEN + OUT_DIM].set(params["wlv"])
    packed["w_head"] = w_head.astype(bf16)

    packed["bn"] = jnp.concatenate(
        [params["g1"], params["g2"], params["g3"], params["g4"],
         params["bt1"], params["bt2"], params["bt3"], params["bt4"]],
        axis=0)  # (8, 128) f32

    hbias = jnp.zeros((1, 2 * HIDDEN), jnp.float32)
    hbias = hbias.at[:, :OUT_DIM].set(params["bmu"])
    hbias = hbias.at[:, HIDDEN:HIDDEN + OUT_DIM].set(params["blv"])
    packed["head_bias"] = hbias
    return packed


@jax.jit
def bc_vis_forward(x, z, eps, packed):
    batch = x.shape[0]
    # Zero-pad eps to a full 128-lane block so the in-kernel elementwise math
    # stays lane-aligned (padding lanes are exact zeros).
    eps_pad = jnp.zeros((batch, HIDDEN), jnp.float32).at[:, :OUT_DIM].set(eps)

    vmem = pl.BlockSpec(memory_space=pltpu.MemorySpace.VMEM)
    # TODO(synk): for large batches, add a batch grid (weights VMEM-resident
    # across steps) with two-pass/cross-tile BN statistics, and set
    # pltpu.CompilerParams(vmem_limit_bytes=...) for v7x's smaller VMEM.
    slab = pl.pallas_call(
        bc_vis_kernel,
        out_shape=jax.ShapeDtypeStruct((batch, 3 * HIDDEN), jnp.float32),
        in_specs=[vmem] * 9,
        out_specs=vmem,
    )(x, z, eps_pad,
      packed["w1x"], packed["w1z"], packed["w_hidden"],
      packed["w_head"], packed["bn"], packed["head_bias"])

    out = slab[:, :OUT_DIM]
    mu = slab[:, HIDDEN:HIDDEN + OUT_DIM]
    logvar = slab[:, 2 * HIDDEN:2 * HIDDEN + OUT_DIM]
    return out, mu, logvar


if __name__ == "__main__":
    key = jax.random.PRNGKey(0)
    k_param, k_x, k_z, k_eps = jax.random.split(key, 4)

    B = 8                      # BatchNorm in train mode needs B >= 2
    x_dim, z_dim = 26, 6
    in_dim = x_dim + z_dim     # 32

    params = init_params(k_param, in_dim)
    packed = pack_params(params, x_dim)

    x = jax.random.normal(k_x, (B, x_dim), jnp.float32)
    z = jax.random.normal(k_z, (B, z_dim), jnp.float32)
    # eps for reparameterization drawn outside the kernel (deterministic here)
    eps = jax.random.normal(k_eps, (B, OUT_DIM), jnp.float32)

    out, mu, logvar = bc_vis_forward(x, z, eps, packed)
    jax.block_until_ready((out, mu, logvar))

    assert out.shape == (B, OUT_DIM)
    assert mu.shape == (B, OUT_DIM)
    assert logvar.shape == (B, OUT_DIM)
    assert bool(jnp.all(jnp.isfinite(out)))
    assert bool(jnp.all(jnp.isfinite(mu)))
    assert bool(jnp.all(jnp.isfinite(logvar)))
    # last column of out/mu must be in (0, 1) after sigmoid
    assert bool(jnp.all((out[:, -1] > 0) & (out[:, -1] < 1)))
    assert bool(jnp.all((mu[:, -1] > 0) & (mu[:, -1] < 1)))

    print("KERNEL_OK")
</pallas_src>

<mosaic_0001>
module attributes {stable_mosaic.version = 11 : i64} {
  func.func @bc_vis_kernel(%arg0: memref<8x26xf32, #tpu.memory_space<vmem>>, %arg1: memref<8x6xf32, #tpu.memory_space<vmem>>, %arg2: memref<8x128xf32, #tpu.memory_space<vmem>>, %arg3: memref<26x128xbf16, #tpu.memory_space<vmem>>, %arg4: memref<6x128xbf16, #tpu.memory_space<vmem>>, %arg5: memref<3x128x128xbf16, #tpu.memory_space<vmem>>, %arg6: memref<128x256xbf16, #tpu.memory_space<vmem>>, %arg7: memref<8x128xf32, #tpu.memory_space<vmem>>, %arg8: memref<1x256xf32, #tpu.memory_space<vmem>>, %arg9: memref<8x384xf32, #tpu.memory_space<vmem>>) attributes {dimension_semantics = [], scalar_prefetch = 0 : i64, scratch_operands = 0 : i64, tpu.core_type = #tpu.core_type<tc>} {
    %c0 = arith.constant 0 : index
    %c0_0 = arith.constant 0 : index
    %0 = vector.load %arg7[%c0, %c0_0] : memref<8x128xf32, #tpu.memory_space<vmem>>, vector<8x128xf32>
    %c0_1 = arith.constant 0 : index
    %c0_2 = arith.constant 0 : index
    %1 = vector.load %arg0[%c0_1, %c0_2] : memref<8x26xf32, #tpu.memory_space<vmem>>, vector<8x26xf32>
    %2 = arith.truncf %1 : vector<8x26xf32> to vector<8x26xbf16>
    %c0_3 = arith.constant 0 : index
    %c0_4 = arith.constant 0 : index
    %3 = vector.load %arg3[%c0_3, %c0_4] : memref<26x128xbf16, #tpu.memory_space<vmem>>, vector<26x128xbf16>
    %cst = arith.constant dense<0.000000e+00> : vector<8x128xf32>
    %4 = tpu.matmul %2, %3, %cst {dimension_numbers = #tpu.dot_dimension_numbers<[1], [0], [0], [1], [0, 0, 1, 1], [], []>} : vector<8x26xbf16>, vector<26x128xbf16>, vector<8x128xf32> -> vector<8x128xf32>
    %c0_5 = arith.constant 0 : index
    %c0_6 = arith.constant 0 : index
    %5 = vector.load %arg1[%c0_5, %c0_6] : memref<8x6xf32, #tpu.memory_space<vmem>>, vector<8x6xf32>
    %6 = arith.truncf %5 : vector<8x6xf32> to vector<8x6xbf16>
    %c0_7 = arith.constant 0 : index
    %c0_8 = arith.constant 0 : index
    %7 = vector.load %arg4[%c0_7, %c0_8] : memref<6x128xbf16, #tpu.memory_space<vmem>>, vector<6x128xbf16>
    %cst_9 = arith.constant dense<0.000000e+00> : vector<8x128xf32>
    %8 = tpu.matmul %6, %7, %cst_9 {dimension_numbers = #tpu.dot_dimension_numbers<[1], [0], [0], [1], [0, 0, 1, 1], [], []>} : vector<8x6xbf16>, vector<6x128xbf16>, vector<8x128xf32> -> vector<8x128xf32>
    %9 = arith.addf %4, %8 : vector<8x128xf32>
    %10 = vector.extract_strided_slice %0 {offsets = [0, 0], sizes = [1, 128], strides = [1, 1]} : vector<8x128xf32> to vector<1x128xf32>
    %11 = vector.extract_strided_slice %0 {offsets = [4, 0], sizes = [1, 128], strides = [1, 1]} : vector<8x128xf32> to vector<1x128xf32>
    %cst_10 = arith.constant dense<0.000000e+00> : vector<128xf32>
    %12 = vector.multi_reduction <add>, %9, %cst_10 [0] : vector<8x128xf32> to vector<128xf32>
    %13 = vector.shape_cast %12 : vector<128xf32> to vector<1x128xf32>
    %cst_11 = arith.constant 8.000000e+00 : f32
    %14 = vector.broadcast %cst_11 : f32 to vector<1x128xf32>
    %15 = arith.divf %13, %14 : vector<1x128xf32>
    %16 = vector.broadcast %15 : vector<1x128xf32> to vector<8x128xf32>
    %17 = arith.subf %9, %16 : vector<8x128xf32>
    %18 = arith.mulf %17, %17 : vector<8x128xf32>
    %cst_12 = arith.constant dense<0.000000e+00> : vector<128xf32>
    %19 = vector.multi_reduction <add>, %18, %cst_12 [0] : vector<8x128xf32> to vector<128xf32>
    %20 = vector.shape_cast %19 : vector<128xf32> to vector<1x128xf32>
    %cst_13 = arith.constant 8.000000e+00 : f32
    %21 = vector.broadcast %cst_13 : f32 to vector<1x128xf32>
    %22 = arith.divf %20, %21 : vector<1x128xf32>
    %cst_14 = arith.constant 9.99999974E-6 : f32
    %23 = vector.broadcast %cst_14 : f32 to vector<1x128xf32>
    %24 = arith.addf %22, %23 : vector<1x128xf32>
    %25 = math.rsqrt %24 : vector<1x128xf32>
    %26 = arith.mulf %10, %25 : vector<1x128xf32>
    %27 = arith.mulf %15, %26 : vector<1x128xf32>
    %28 = arith.subf %11, %27 : vector<1x128xf32>
    %29 = vector.broadcast %26 : vector<1x128xf32> to vector<8x128xf32>
    %30 = arith.mulf %9, %29 : vector<8x128xf32>
    %31 = vector.broadcast %28 : vector<1x128xf32> to vector<8x128xf32>
    %32 = arith.addf %30, %31 : vector<8x128xf32>
    %cst_15 = arith.constant 0.000000e+00 : f32
    %33 = vector.broadcast %cst_15 : f32 to vector<8x128xf32>
    %34 = arith.maximumf %32, %33 : vector<8x128xf32>
    %35 = arith.truncf %34 : vector<8x128xf32> to vector<8x128xbf16>
    %c0_16 = arith.constant 0 : index
    %c0_17 = arith.constant 0 : index
    %c0_18 = arith.constant 0 : index
    %36 = vector.load %arg5[%c0_16, %c0_17, %c0_18] : memref<3x128x128xbf16, #tpu.memory_space<vmem>>, vector<1x128x128xbf16>
    %37 = vector.shape_cast %36 : vector<1x128x128xbf16> to vector<128x128xbf16>
    %cst_19 = arith.constant dense<0.000000e+00> : vector<8x128xf32>
    %38 = tpu.matmul %35, %37, %cst_19 {dimension_numbers = #tpu.dot_dimension_numbers<[1], [0], [0], [1], [0, 0, 1, 1], [], []>} : vector<8x128xbf16>, vector<128x128xbf16>, vector<8x128xf32> -> vector<8x128xf32>
    %39 = vector.extract_strided_slice %0 {offsets = [1, 0], sizes = [1, 128], strides = [1, 1]} : vector<8x128xf32> to vector<1x128xf32>
    %40 = vector.extract_strided_slice %0 {offsets = [5, 0], sizes = [1, 128], strides = [1, 1]} : vector<8x128xf32> to vector<1x128xf32>
    %cst_20 = arith.constant dense<0.000000e+00> : vector<128xf32>
    %41 = vector.multi_reduction <add>, %38, %cst_20 [0] : vector<8x128xf32> to vector<128xf32>
    %42 = vector.shape_cast %41 : vector<128xf32> to vector<1x128xf32>
    %cst_21 = arith.constant 8.000000e+00 : f32
    %43 = vector.broadcast %cst_21 : f32 to vector<1x128xf32>
    %44 = arith.divf %42, %43 : vector<1x128xf32>
    %45 = vector.broadcast %44 : vector<1x128xf32> to vector<8x128xf32>
    %46 = arith.subf %38, %45 : vector<8x128xf32>
    %47 = arith.mulf %46, %46 : vector<8x128xf32>
    %cst_22 = arith.constant dense<0.000000e+00> : vector<128xf32>
    %48 = vector.multi_reduction <add>, %47, %cst_22 [0] : vector<8x128xf32> to vector<128xf32>
    %49 = vector.shape_cast %48 : vector<128xf32> to vector<1x128xf32>
    %cst_23 = arith.constant 8.000000e+00 : f32
    %50 = vector.broadcast %cst_23 : f32 to vector<1x128xf32>
    %51 = arith.divf %49, %50 : vector<1x128xf32>
    %cst_24 = arith.constant 9.99999974E-6 : f32
    %52 = vector.broadcast %cst_24 : f32 to vector<1x128xf32>
    %53 = arith.addf %51, %52 : vector<1x128xf32>
    %54 = math.rsqrt %53 : vector<1x128xf32>
    %55 = arith.mulf %39, %54 : vector<1x128xf32>
    %56 = arith.mulf %44, %55 : vector<1x128xf32>
    %57 = arith.subf %40, %56 : vector<1x128xf32>
    %58 = vector.broadcast %55 : vector<1x128xf32> to vector<8x128xf32>
    %59 = arith.mulf %38, %58 : vector<8x128xf32>
    %60 = vector.broadcast %57 : vector<1x128xf32> to vector<8x128xf32>
    %61 = arith.addf %59, %60 : vector<8x128xf32>
    %cst_25 = arith.constant 0.000000e+00 : f32
    %62 = vector.broadcast %cst_25 : f32 to vector<8x128xf32>
    %63 = arith.maximumf %61, %62 : vector<8x128xf32>
    %64 = arith.truncf %63 : vector<8x128xf32> to vector<8x128xbf16>
    %c1 = arith.constant 1 : index
    %c0_26 = arith.constant 0 : index
    %c0_27 = arith.constant 0 : index
    %65 = vector.load %arg5[%c1, %c0_26, %c0_27] : memref<3x128x128xbf16, #tpu.memory_space<vmem>>, vector<1x128x128xbf16>
    %66 = vector.shape_cast %65 : vector<1x128x128xbf16> to vector<128x128xbf16>
    %cst_28 = arith.constant dense<0.000000e+00> : vector<8x128xf32>
    %67 = tpu.matmul %64, %66, %cst_28 {dimension_numbers = #tpu.dot_dimension_numbers<[1], [0], [0], [1], [0, 0, 1, 1], [], []>} : vector<8x128xbf16>, vector<128x128xbf16>, vector<8x128xf32> -> vector<8x128xf32>
    %68 = vector.extract_strided_slice %0 {offsets = [2, 0], sizes = [1, 128], strides = [1, 1]} : vector<8x128xf32> to vector<1x128xf32>
    %69 = vector.extract_strided_slice %0 {offsets = [6, 0], sizes = [1, 128], strides = [1, 1]} : vector<8x128xf32> to vector<1x128xf32>
    %cst_29 = arith.constant dense<0.000000e+00> : vector<128xf32>
    %70 = vector.multi_reduction <add>, %67, %cst_29 [0] : vector<8x128xf32> to vector<128xf32>
    %71 = vector.shape_cast %70 : vector<128xf32> to vector<1x128xf32>
    %cst_30 = arith.constant 8.000000e+00 : f32
    %72 = vector.broadcast %cst_30 : f32 to vector<1x128xf32>
    %73 = arith.divf %71, %72 : vector<1x128xf32>
    %74 = vector.broadcast %73 : vector<1x128xf32> to vector<8x128xf32>
    %75 = arith.subf %67, %74 : vector<8x128xf32>
    %76 = arith.mulf %75, %75 : vector<8x128xf32>
    %cst_31 = arith.constant dense<0.000000e+00> : vector<128xf32>
    %77 = vector.multi_reduction <add>, %76, %cst_31 [0] : vector<8x128xf32> to vector<128xf32>
    %78 = vector.shape_cast %77 : vector<128xf32> to vector<1x128xf32>
    %cst_32 = arith.constant 8.000000e+00 : f32
    %79 = vector.broadcast %cst_32 : f32 to vector<1x128xf32>
    %80 = arith.divf %78, %79 : vector<1x128xf32>
    %cst_33 = arith.constant 9.99999974E-6 : f32
    %81 = vector.broadcast %cst_33 : f32 to vector<1x128xf32>
    %82 = arith.addf %80, %81 : vector<1x128xf32>
    %83 = math.rsqrt %82 : vector<1x128xf32>
    %84 = arith.mulf %68, %83 : vector<1x128xf32>
    %85 = arith.mulf %73, %84 : vector<1x128xf32>
    %86 = arith.subf %69, %85 : vector<1x128xf32>
    %87 = vector.broadcast %84 : vector<1x128xf32> to vector<8x128xf32>
    %88 = arith.mulf %67, %87 : vector<8x128xf32>
    %89 = vector.broadcast %86 : vector<1x128xf32> to vector<8x128xf32>
    %90 = arith.addf %88, %89 : vector<8x128xf32>
    %cst_34 = arith.constant 0.000000e+00 : f32
    %91 = vector.broadcast %cst_34 : f32 to vector<8x128xf32>
    %92 = arith.maximumf %90, %91 : vector<8x128xf32>
    %93 = arith.truncf %92 : vector<8x128xf32> to vector<8x128xbf16>
    %c2 = arith.constant 2 : index
    %c0_35 = arith.constant 0 : index
    %c0_36 = arith.constant 0 : index
    %94 = vector.load %arg5[%c2, %c0_35, %c0_36] : memref<3x128x128xbf16, #tpu.memory_space<vmem>>, vector<1x128x128xbf16>
    %95 = vector.shape_cast %94 : vector<1x128x128xbf16> to vector<128x128xbf16>
    %cst_37 = arith.constant dense<0.000000e+00> : vector<8x128xf32>
    %96 = tpu.matmul %93, %95, %cst_37 {dimension_numbers = #tpu.dot_dimension_numbers<[1], [0], [0], [1], [0, 0, 1, 1], [], []>} : vector<8x128xbf16>, vector<128x128xbf16>, vector<8x128xf32> -> vector<8x128xf32>
    %97 = vector.extract_strided_slice %0 {offsets = [3, 0], sizes = [1, 128], strides = [1, 1]} : vector<8x128xf32> to vector<1x128xf32>
    %98 = vector.extract_strided_slice %0 {offsets = [7, 0], sizes = [1, 128], strides = [1, 1]} : vector<8x128xf32> to vector<1x128xf32>
    %cst_38 = arith.constant dense<0.000000e+00> : vector<128xf32>
    %99 = vector.multi_reduction <add>, %96, %cst_38 [0] : vector<8x128xf32> to vector<128xf32>
    %100 = vector.shape_cast %99 : vector<128xf32> to vector<1x128xf32>
    %cst_39 = arith.constant 8.000000e+00 : f32
    %101 = vector.broadcast %cst_39 : f32 to vector<1x128xf32>
    %102 = arith.divf %100, %101 : vector<1x128xf32>
    %103 = vector.broadcast %102 : vector<1x128xf32> to vector<8x128xf32>
    %104 = arith.subf %96, %103 : vector<8x128xf32>
    %105 = arith.mulf %104, %104 : vector<8x128xf32>
    %cst_40 = arith.constant dense<0.000000e+00> : vector<128xf32>
    %106 = vector.multi_reduction <add>, %105, %cst_40 [0] : vector<8x128xf32> to vector<128xf32>
    %107 = vector.shape_cast %106 : vector<128xf32> to vector<1x128xf32>
    %cst_41 = arith.constant 8.000000e+00 : f32
    %108 = vector.broadcast %cst_41 : f32 to vector<1x128xf32>
    %109 = arith.divf %107, %108 : vector<1x128xf32>
    %cst_42 = arith.constant 9.99999974E-6 : f32
    %110 = vector.broadcast %cst_42 : f32 to vector<1x128xf32>
    %111 = arith.addf %109, %110 : vector<1x128xf32>
    %112 = math.rsqrt %111 : vector<1x128xf32>
    %113 = arith.mulf %97, %112 : vector<1x128xf32>
    %114 = arith.mulf %102, %113 : vector<1x128xf32>
    %115 = arith.subf %98, %114 : vector<1x128xf32>
    %116 = vector.broadcast %113 : vector<1x128xf32> to vector<8x128xf32>
    %117 = arith.mulf %96, %116 : vector<8x128xf32>
    %118 = vector.broadcast %115 : vector<1x128xf32> to vector<8x128xf32>
    %119 = arith.addf %117, %118 : vector<8x128xf32>
    %cst_43 = arith.constant 0.000000e+00 : f32
    %120 = vector.broadcast %cst_43 : f32 to vector<8x128xf32>
    %121 = arith.maximumf %119, %120 : vector<8x128xf32>
    %122 = arith.truncf %121 : vector<8x128xf32> to vector<8x128xbf16>
    %c0_44 = arith.constant 0 : index
    %c0_45 = arith.constant 0 : index
    %123 = vector.load %arg6[%c0_44, %c0_45] : memref<128x256xbf16, #tpu.memory_space<vmem>>, vector<128x256xbf16>
    %cst_46 = arith.constant dense<0.000000e+00> : vector<8x256xf32>
    %124 = tpu.matmul %122, %123, %cst_46 {dimension_numbers = #tpu.dot_dimension_numbers<[1], [0], [0], [1], [0, 0, 1, 1], [], []>} : vector<8x128xbf16>, vector<128x256xbf16>, vector<8x256xf32> -> vector<8x256xf32>
    %c0_47 = arith.constant 0 : index
    %c0_48 = arith.constant 0 : index
    %125 = vector.load %arg8[%c0_47, %c0_48] : memref<1x256xf32, #tpu.memory_space<vmem>>, vector<1x256xf32>
    %126 = vector.broadcast %125 : vector<1x256xf32> to vector<8x256xf32>
    %127 = arith.addf %124, %126 : vector<8x256xf32>
    %128 = vector.extract_strided_slice %127 {offsets = [0, 0], sizes = [8, 128], strides = [1, 1]} : vector<8x256xf32> to vector<8x128xf32>
    %129 = vector.extract_strided_slice %127 {offsets = [0, 128], sizes = [8, 128], strides = [1, 1]} : vector<8x256xf32> to vector<8x128xf32>
    %cst_49 = arith.constant 5.000000e-01 : f32
    %130 = vector.broadcast %cst_49 : f32 to vector<8x128xf32>
    %131 = arith.mulf %130, %129 : vector<8x128xf32>
    %132 = math.exp %131 : vector<8x128xf32>
    %c0_50 = arith.constant 0 : index
    %c0_51 = arith.constant 0 : index
    %133 = vector.load %arg2[%c0_50, %c0_51] : memref<8x128xf32, #tpu.memory_space<vmem>>, vector<8x128xf32>
    %134 = arith.mulf %132, %133 : vector<8x128xf32>
    %135 = arith.addf %128, %134 : vector<8x128xf32>
    %136 = tpu.iota {dimensions = array<i32: 1>} : vector<8x128xi32>
    %c6_i32 = arith.constant 6 : i32
    %137 = vector.broadcast %c6_i32 : i32 to vector<8x128xi32>
    %138 = arith.cmpi eq, %136, %137 : vector<8x128xi32>
    %139 = arith.negf %128 : vector<8x128xf32>
    %140 = math.exp %139 : vector<8x128xf32>
    %cst_52 = arith.constant 1.000000e+00 : f32
    %141 = vector.broadcast %cst_52 : f32 to vector<8x128xf32>
    %142 = arith.addf %141, %140 : vector<8x128xf32>
    %143 = arith.divf %141, %142 : vector<8x128xf32>
    %144 = arith.select %138, %143, %128 : vector<8x128xi1>, vector<8x128xf32>
    %145 = arith.negf %135 : vector<8x128xf32>
    %146 = math.exp %145 : vector<8x128xf32>
    %cst_53 = arith.constant 1.000000e+00 : f32
    %147 = vector.broadcast %cst_53 : f32 to vector<8x128xf32>
    %148 = arith.addf %147, %146 : vector<8x128xf32>
    %149 = arith.divf %147, %148 : vector<8x128xf32>
    %150 = arith.select %138, %149, %135 : vector<8x128xi1>, vector<8x128xf32>
    %151 = tpu.concatenate %150, %144, %129 in 1 : vector<8x128xf32>, vector<8x128xf32>, vector<8x128xf32> -> vector<8x384xf32>
    %c0_54 = arith.constant 0 : index
    %c0_55 = arith.constant 0 : index
    %152 = vector.load %arg9[%c0_54, %c0_55] : memref<8x384xf32, #tpu.memory_space<vmem>>, vector<8x384xf32>
    tpu.vector_store %arg9[%c0_54, %c0_55], %151 {strides = array<i32>} : memref<8x384xf32, #tpu.memory_space<vmem>>, vector<8x384xf32>,
    return
  }
}

</mosaic_0001>

<bundles_post_ra>
// kernel: bc_vis_forward.1
= control target key start
LH: loop header
LB: loop body
LE: loop exit
PB: predicated region body
PF: predicated region fallthrough
CT: control target
= control target key end

     0   :  { %14 = vsyncpa [#allocation3], 0  ;;  %s1289_s0 = inlined_call_operand.vmem [shape: f32[8,26], index: 0, kind: input, shape index: {}]   ;;  %s1290_s1 = inlined_call_operand.vmem [shape: f32[8,6], index: 1, kind: input, shape index: {}]   ;;  %s1291_s2 = inlined_call_operand.vmem [shape: f32[8,128], index: 2, kind: input, shape index: {}]   ;;  %s1292_s3 = inlined_call_operand.vmem [shape: bf16[26,128], index: 3, kind: input, shape index: {}]   ;;  %s1293_s4 = inlined_call_operand.vmem [shape: bf16[6,128], index: 4, kind: input, shape index: {}]   ;;  %s1294_s5 = inlined_call_operand.hbm [shape: bf16[3,128,128], index: 5, kind: input, shape index: {}]   ;;  %s1295_s6 = inlined_call_operand.hbm [shape: bf16[128,256], index: 6, kind: input, shape index: {}]   ;;  %s1296_s7 = inlined_call_operand.vmem [shape: f32[8,128], index: 7, kind: input, shape index: {}]   ;;  %s1297_s8 = inlined_call_operand.hbm [shape: f32[1,256], index: 8, kind: input, shape index: {}]   ;;  %s1298_s9 = inlined_call_operand.vmem [shape: f32[8,384], index: 9, kind: output, shape index: {}]  }
   0x1   :  { %15 = vsyncpa [#allocation5], 0  ;;  %s1123_s30 = smov [#allocation4]  }
   0x2   :  { %s43_s10 = sshll.u32 %s1123_s30, 4  ;;  %s44_s10 = int_to_ptr.vmem [resolvable:$true] %s43_s10 }
   0x3   :  { %s1067_s11 = scalar_lea.vmem %s44_s10, 2048  ;;  %p1072_p1 = scmp.lt.s32.totalorder %s44_s10, %s44_s10 }
   0x4   :  { %p1068_p0 = scmp.ne.s32.totalorder %s44_s10, %s1067_s11  ;;  %p1073_p2 = scmp.lt.s32.totalorder %s1067_s11, %s1067_s11 }
   0x6   :  { %p1074_p3 = por %p1073_p2, %p1072_p1 }
   0x8   :  { %p1075_p4 = pnand %p1074_p3, %p1068_p0 }
   0xa   :  { %1078 = shalt.err (!%p1075_p4)
}
   0xb   :  { %s1124_s12 = smov 128   ;;  %s1125_s13 = smov 8  }
   0xc   :  { %49 = dma.hbm_to_vmem [thread:$0]  %s1295_s6, 2048, %s44_s10, [#allocation5], %s1124_s12, %s1124_s12, %s1125_s13  }
   0xd   :  { %s1126_s16 = smov [#allocation2]  }
   0xe   :  { %s31_s17 = sshll.u32 %s1126_s16, 4  ;;  %s32_s17 = int_to_ptr.vmem [resolvable:$true] %s31_s17 }
   0xf   :  { %s1087_s18 = scalar_lea.vmem %s32_s17, 3072  ;;  %p1092_p6 = scmp.lt.s32.totalorder %s32_s17, %s32_s17 }
  0x10   :  { %p1088_p5 = scmp.ne.s32.totalorder %s32_s17, %s1087_s18  ;;  %p1093_p7 = scmp.lt.s32.totalorder %s1087_s18, %s1087_s18 }
  0x12   :  { %p1094_p8 = por %p1093_p7, %p1092_p6 }
  0x14   :  { %p1095_p9 = pnand %p1094_p8, %p1088_p5 }
  0x16   :  { %1098 = shalt.err (!%p1095_p9)
}
  0x17   :  { %s1127_s19 = smov 64   ;;  %s1128_s20 = smov 4  }
  0x18   :  { %37 = dma.hbm_to_vmem [thread:$0]  %s1294_s5, 3072, %s32_s17, [#allocation3], %s1127_s19, %s1127_s19, %s1128_s20  }
  0x19   :  { %s1129_s23 = smov [#allocation6]  }
  0x1a   :  { %s58_s24 = sshll.u32 %s1129_s23, 4  ;;  %s59_s24 = int_to_ptr.vmem [resolvable:$true] %s58_s24 }
  0x1b   :  { %s1107_s6 = scalar_lea.vmem %s59_s24, 32  ;;  %p1112_p11 = scmp.lt.s32.totalorder %s59_s24, %s59_s24 }
  0x1c   :  { %p1108_p10 = scmp.ne.s32.totalorder %s59_s24, %s1107_s6  ;;  %p1113_p12 = scmp.lt.s32.totalorder %s1107_s6, %s1107_s6 }
  0x1e   :  { %p1114_p13 = por %p1113_p12, %p1112_p11 }
  0x20   :  { %p1115_p0 = pnand %p1114_p13, %p1108_p10 }
  0x22   :  { %1118 = shalt.err (!%p1115_p0)
}
  0x23   :  { %61 = dma.hbm_to_vmem [thread:$0]  %s1297_s8, 32, %s59_s24, [#allocation5]  }
  0x24   :  { %1119 = dma.done.wait [#allocation3], 3072  }
  0x25   :  { %1120 = vsyncadd [#allocation3], 4294964224 }
  0x26   :  { %1121 = dma.done.wait [#allocation5], 2080  }
  0x27   :  { %1122 = vsyncadd [#allocation5], 4294965216  ;;  %v1130_v0 = vmov 0.0   ;;  %vm1131_vm0 = vmmov 0   ;;  %vm86_vm1 = vcmask 1042432   ;;  %vm145_vm2 = vcmask 1044480  }
  0x28   :  { %907 = vmatprep.subr.bf16.mxu0 %v1130_v0  ;;  %913 = vmatprep.subr.bf16.mxu1 %v1130_v0  ;;  %v81_v1 = vld [vmem:[%s1293_s4] sm:$0x7]  ;;  %v991_v3 = vld [vmem:[%s1292_s3 + $0x8] sm:$0x1f]   ;;  %vm82_vm3 = vcmask 48128   ;;  %vm141_vm4 = vcmask 211968   ;;  %v214_v44 = vlaneseq }
  0x29   :  { %909 = vmatprep.mubr.msk.bf16.mxu0 %vm1131_vm0, %v1130_v0  ;;  %917 = vmatprep.mubr.msk.bf16.mxu1 %vm1131_vm0, %v1130_v0  ;;  %v88_v2 = vsel %vm86_vm1, %v81_v1, 0  ;;  %v79_v4 = vld [vmem:[%s1290_s1] sm:$0xff]  ;;  %v147_v8 = vsel %vm145_vm2, %v991_v3, 0  ;;  %v993_v10 = vld [vmem:[#allocation2 + $0x38] sm:$0xff]   ;;  %v994_v11 = vld [vmem:[#allocation2 + $0x30] sm:$0xff]  }
  0x2a   :  { %908 = vmatpush3.bf16.msra.mxu0 %v88_v2  ;;  %v80_v5 = vpack.c.bf16 %v79_v4, %v79_v4  ;;  %v992_v6 = vld [vmem:[%s1292_s3] sm:$0xff]   ;;  %914 = vmatpush3.bf16.msra.mxu1 %v147_v8  ;;  %v995_v12 = vld [vmem:[#allocation2 + $0x28] sm:$0xff]   ;;  %v997_v14 = vld [vmem:[#allocation2 + $0x18] sm:$0xff]   ;;  %v1229_v45 = vshrl.u32 %v214_v44, 7 }
  0x2b   :  { %v73_v7 = vld [vmem:[%s1289_s0] sm:$0xff]  ;;  %921 = vmatprep.subr.bf16.mxu0 %v1130_v0  ;;  %915 = vmatprep.subr.bf16.mxu1 %v1130_v0  ;;  %v998_v15 = vld [vmem:[#allocation2 + $0x10] sm:$0xff]   ;;  %v999_v16 = vld [vmem:[#allocation2 + $0x8] sm:$0xff]  }
  0x2c   :  { %v74_v9 = vpack.c.bf16 %v73_v7, %v73_v7  ;;  %v996_v13 = vld [vmem:[#allocation2 + $0x20] sm:$0xff]   ;;  %v216_v49 = vsub.s32 0, %v1229_v45  ;;  %v221_v53 = vsub.s32 4, %v1229_v45  ;;  %v1001_v60 = vld [vmem:[#allocation2 + $0x78] sm:$0xff]   ;;  %v1002_v61 = vld [vmem:[#allocation2 + $0x70] sm:$0xff]  }
  0x2d   :  { %910 = vmatmul.mubr.msk.bf16.vlgmr.msra.gmra.mxu0 %vm82_vm3, %v80_v5  ;;  %v1000_v17 = vld [vmem:[#allocation2] sm:$0xff]   ;;  %v1003_v62 = vld [vmem:[#allocation2 + $0x68] sm:$0xff]   ;;  %v1005_v1 = vld [vmem:[#allocation2 + $0x58] sm:$0xff]  }
  0x2e   :  { %937 = vmatprep.mubr.msk.bf16.mxu0 %vm1131_vm0, %v1130_v0  ;;  %916 = vmatpush3.bf16.msra.mxu1 %v992_v6  ;;  %v1234_v46 = vld [vmem:[%s1296_s7] sm:$0xff]  ;;  %v1006_v2 = vld [vmem:[#allocation2 + $0x50] sm:$0xff]   ;;  %v1007_v3 = vld [vmem:[#allocation2 + $0x48] sm:$0xff]  }
  0x2f   :  { %941 = vmatprep.subr.bf16.mxu1 %v1130_v0  ;;  %922 = vmatpush3.bf16.msra.mxu0 %v993_v10  ;;  %v1004_v63 = vld [vmem:[#allocation2 + $0x60] sm:$0xff]  }
  0x30   :  { %923 = vmatprep.subr.bf16.mxu0 %v1130_v0  ;;  %v1008_v4 = vld [vmem:[#allocation2 + $0x40] sm:$0xff]  }
  0x31   :  { %918 = vmatmul.mubr.msk.bf16.vlgmr.msra.gmra.mxu1 %vm141_vm4, %v74_v9 }
  0x32   :  { %957 = vmatprep.mubr.msk.bf16.mxu1 %vm1131_vm0, %v1130_v0  ;;  %942 = vmatpush3.bf16.msra.mxu1 %v1001_v60 }
  0x33   :  { %924 = vmatpush3.bf16.msra.mxu0 %v994_v11  ;;  %943 = vmatprep.subr.bf16.mxu1 %v1130_v0 }
  0x34   :  { %925 = vmatprep.subr.bf16.mxu0 %v1130_v0 }
  0x36   :  { %944 = vmatpush3.bf16.msra.mxu1 %v1002_v61 }
  0x37   :  { %926 = vmatpush3.bf16.msra.mxu0 %v995_v12  ;;  %945 = vmatprep.subr.bf16.mxu1 %v1130_v0 }
  0x38   :  { %927 = vmatprep.subr.bf16.mxu0 %v1130_v0 }
  0x3a   :  { %946 = vmatpush3.bf16.msra.mxu1 %v1003_v62 }
  0x3b   :  { %928 = vmatpush3.bf16.msra.mxu0 %v996_v13  ;;  %947 = vmatprep.subr.bf16.mxu1 %v1130_v0 }
  0x3c   :  { %929 = vmatprep.subr.bf16.mxu0 %v1130_v0 }
  0x3e   :  { %948 = vmatpush3.bf16.msra.mxu1 %v1004_v63 }
  0x3f   :  { %930 = vmatpush3.bf16.msra.mxu0 %v997_v14  ;;  %949 = vmatprep.subr.bf16.mxu1 %v1130_v0 }
  0x40   :  { %931 = vmatprep.subr.bf16.mxu0 %v1130_v0 }
  0x42   :  { %950 = vmatpush3.bf16.msra.mxu1 %v1005_v1 }
  0x43   :  { %932 = vmatpush3.bf16.msra.mxu0 %v998_v15  ;;  %951 = vmatprep.subr.bf16.mxu1 %v1130_v0 }
  0x44   :  { %933 = vmatprep.subr.bf16.mxu0 %v1130_v0 }
  0x46   :  { %952 = vmatpush3.bf16.msra.mxu1 %v1006_v2 }
  0x47   :  { %934 = vmatpush3.bf16.msra.mxu0 %v999_v16  ;;  %953 = vmatprep.subr.bf16.mxu1 %v1130_v0 }
  0x48   :  { %935 = vmatprep.subr.bf16.mxu0 %v1130_v0 }
  0x4a   :  { %954 = vmatpush3.bf16.msra.mxu1 %v1007_v3 }
  0x4b   :  { %936 = vmatpush3.bf16.msra.mxu0 %v1000_v17  ;;  %955 = vmatprep.subr.bf16.mxu1 %v1130_v0 }
  0x4c   :  { %961 = vmatprep.subr.bf16.mxu0 %v1130_v0 }
  0x4e   :  { %956 = vmatpush3.bf16.msra.mxu1 %v1008_v4 }
  0xed   :  { %v124_v18 = vpop.f32.mrf.mxu0 }
  0xef   :  { %v911_v19 = vpop.f32.mrf.mxu0 }
  0xf1   :  { %v127_v20 = vpop.f32.mrf.mxu0  ;;  %v183_v22 = vpop.f32.mrf.mxu1 }
  0xf2   :  { %v184_v23 = vadd.f32 %v183_v22, %v124_v18 }
  0xf3   :  { %v912_v21 = vpop.f32.mrf.mxu0  ;;  %v919_v24 = vpop.f32.mrf.mxu1 }
  0xf4   :  { %v189_v25 = vrot.slane %v184_v23, 4 }
  0xf5   :  { %v186_v26 = vpop.f32.mrf.mxu1 }
  0xf6   :  { %v190_v27 = vadd.f32 %v189_v25, %v184_v23 }
  0xf7   :  { %v920_v28 = vpop.f32.mrf.mxu1 }
  0xf8   :  { %v191_v29 = vrot.slane %v190_v27, 2  ;;  %v356_v28 = vsub.s32 1, %v1229_v45 }
  0xfa   :  { %v192_v30 = vadd.f32 %v191_v29, %v190_v27 }
  0xfc   :  { %v193_v31 = vrot.slane %v192_v30, 1 }
  0xfe   :  { %v194_v32 = vadd.f32 %v193_v31, %v192_v30 }
 0x100   :  { %v196_v33 = vmul.f32 0.125, %v194_v32  ;;  %v361_v32 = vsub.s32 5, %v1229_v45 }
 0x102   :  { %v197_v34 = vsub.f32 %v184_v23, %v196_v33 }
 0x104   :  { %v198_v35 = vmul.f32 %v197_v34, %v197_v34 }
 0x106   :  { %v199_v36 = vrot.slane %v198_v35, 4 }
 0x108   :  { %v200_v37 = vadd.f32 %v199_v36, %v198_v35 }
 0x10a   :  { %v201_v38 = vrot.slane %v200_v37, 2 }
 0x10c   :  { %v202_v39 = vadd.f32 %v201_v38, %v200_v37 }
 0x10e   :  { %v203_v40 = vrot.slane %v202_v39, 1 }
 0x110   :  { %v204_v41 = vadd.f32 %v203_v40, %v202_v39  ;;  %v1009_v39 = vld [vmem:[#allocation2 + $0xb8] sm:$0xff]   ;;  %v1010_v40 = vld [vmem:[#allocation2 + $0xb0] sm:$0xff]  }
 0x112   :  { %v205_v42 = vmul.f32 0.125, %v204_v41  ;;  %v1011_v41 = vld [vmem:[#allocation2 + $0xa8] sm:$0xff]  }
 0x114   :  { %v206_v43 = vadd.f32 1e-05, %v205_v42  ;;  %v1012_v42 = vld [vmem:[#allocation2 + $0xa0] sm:$0xff]  }
 0x116   :  { %1041 = vrsqrt.f32 %v206_v43  ;;  %v1013_v43 = vld [vmem:[#allocation2 + $0x98] sm:$0xff]  }
 0x123   :  { %v1042_v47 = vpop.eup %1041 }
 0x124   :  { %v208_v48 = vmul.f32 %v1042_v47, %v1234_v46  ;;  %v1014_v47 = vld [vmem:[#allocation2 + $0x90] sm:$0xff]  }
 0x126   :  { %v209_v50 = vmul.f32 %v208_v48, %v196_v33  ;;  %v217_v52 = vrot.slane %v208_v48, %v216_v49  ;;  %v1015_v48 = vld [vmem:[#allocation2 + $0x88] sm:$0xff]  }
 0x128   :  { %v211_v51 = vrot.slane %v209_v50, 4  ;;  %v218_v55 = vmul.f32 %v217_v52, %v184_v23  ;;  %v1016_v50 = vld [vmem:[#allocation2 + $0x80] sm:$0xff]  }
 0x12a   :  { %v213_v54 = vsub.f32 %v1234_v46, %v211_v51 }
 0x12c   :  { %v222_v56 = vrot.slane %v213_v54, %v221_v53 }
 0x12e   :  { %v223_v57 = vadd.f32 %v222_v56, %v218_v55 }
 0x130   :  { %v224_v58 = vmax.f32 %v223_v57, 0.0 }
 0x132   :  { %v225_v59 = vpack.c.bf16 %v224_v58, %v224_v58 }
 0x134   :  { %938 = vmatmul.mubr.bf16.vlgmr.msra.gmra.mxu0 %v225_v59 }
 0x135   :  { %977 = vmatprep.mubr.msk.bf16.mxu0 %vm1131_vm0, %v1130_v0  ;;  %962 = vmatpush3.bf16.msra.mxu0 %v1009_v39 }
 0x136   :  { %963 = vmatprep.subr.bf16.mxu0 %v1130_v0 }
 0x139   :  { %964 = vmatpush3.bf16.msra.mxu0 %v1010_v40 }
 0x13a   :  { %965 = vmatprep.subr.bf16.mxu0 %v1130_v0 }
 0x13d   :  { %966 = vmatpush3.bf16.msra.mxu0 %v1011_v41 }
 0x13e   :  { %967 = vmatprep.subr.bf16.mxu0 %v1130_v0 }
 0x141   :  { %968 = vmatpush3.bf16.msra.mxu0 %v1012_v42 }
 0x142   :  { %969 = vmatprep.subr.bf16.mxu0 %v1130_v0 }
 0x145   :  { %970 = vmatpush3.bf16.msra.mxu0 %v1013_v43 }
 0x146   :  { %971 = vmatprep.subr.bf16.mxu0 %v1130_v0 }
 0x149   :  { %972 = vmatpush3.bf16.msra.mxu0 %v1014_v47 }
 0x14a   :  { %973 = vmatprep.subr.bf16.mxu0 %v1130_v0 }
 0x14d   :  { %974 = vmatpush3.bf16.msra.mxu0 %v1015_v48 }
 0x14e   :  { %975 = vmatprep.subr.bf16.mxu0 %v1130_v0 }
 0x151   :  { %976 = vmatpush3.bf16.msra.mxu0 %v1016_v50 }
 0x1f4   :  { %v324_v5 = vpop.f32.mrf.mxu0 }
 0x1f5   :  { %v330_v6 = vrot.slane %v324_v5, 4 }
 0x1f6   :  { %v939_v7 = vpop.f32.mrf.mxu0 }
 0x1f7   :  { %v331_v8 = vadd.f32 %v330_v6, %v324_v5 }
 0x1f8   :  { %v327_v9 = vpop.f32.mrf.mxu0 }
 0x1f9   :  { %v332_v10 = vrot.slane %v331_v8, 2 }
 0x1fa   :  { %v940_v11 = vpop.f32.mrf.mxu0 }
 0x1fb   :  { %v333_v12 = vadd.f32 %v332_v10, %v331_v8  ;;  %v497_v10 = vsub.s32 2, %v1229_v45 }
 0x1fd   :  { %v334_v13 = vrot.slane %v333_v12, 1 }
 0x1ff   :  { %v335_v14 = vadd.f32 %v334_v13, %v333_v12 }
 0x201   :  { %v336_v15 = vmul.f32 0.125, %v335_v14  ;;  %v502_v14 = vsub.s32 6, %v1229_v45 }
 0x203   :  { %v337_v16 = vsub.f32 %v324_v5, %v336_v15 }
 0x205   :  { %v338_v17 = vmul.f32 %v337_v16, %v337_v16 }
 0x207   :  { %v339_v18 = vrot.slane %v338_v17, 4 }
 0x209   :  { %v340_v19 = vadd.f32 %v339_v18, %v338_v17 }
 0x20b   :  { %v341_v20 = vrot.slane %v340_v19, 2 }
 0x20d   :  { %v342_v21 = vadd.f32 %v341_v20, %v340_v19 }
 0x20f   :  { %v343_v22 = vrot.slane %v342_v21, 1 }
 0x211   :  { %v344_v23 = vadd.f32 %v343_v22, %v342_v21  ;;  %v1019_v21 = vld [vmem:[#allocation4 + $0x74] ss:$8 sps:$4 sm:$0xff]   ;;  %v1017_v22 = vld [vmem:[#allocation4 + $0x70] ss:$8 sps:$4 sm:$0xff]  }
 0x212   :  { %756 = vmatprep.subr.bf16.mxu1 %v1019_v21 }
 0x213   :  { %v345_v24 = vmul.f32 0.125, %v344_v23  ;;  %v1022_v23 = vld [vmem:[#allocation4 + $0x64] ss:$8 sps:$4 sm:$0xff]  }
 0x215   :  { %v346_v25 = vadd.f32 1e-05, %v345_v24  ;;  %v1020_v24 = vld [vmem:[#allocation4 + $0x60] ss:$8 sps:$4 sm:$0xff]  }
 0x217   :  { %1043 = vrsqrt.f32 %v346_v25  ;;  %v1025_v25 = vld [vmem:[#allocation4 + $0x54] ss:$8 sps:$4 sm:$0xff]  }
 0x224   :  { %v1044_v26 = vpop.eup %1043 }
 0x225   :  { %v348_v27 = vmul.f32 %v1044_v26, %v1234_v46  ;;  %v1023_v26 = vld [vmem:[#allocation4 + $0x50] ss:$8 sps:$4 sm:$0xff]  }
 0x227   :  { %v349_v29 = vmul.f32 %v348_v27, %v336_v15  ;;  %v357_v31 = vrot.slane %v348_v27, %v356_v28  ;;  %v1028_v27 = vld [vmem:[#allocation4 + $0x44] ss:$8 sps:$4 sm:$0xff]  }
 0x229   :  { %v351_v30 = vrot.slane %v349_v29, 4  ;;  %v358_v34 = vmul.f32 %v357_v31, %v324_v5  ;;  %v1026_v29 = vld [vmem:[#allocation4 + $0x40] ss:$8 sps:$4 sm:$0xff]   ;;  %v1029_v31 = vld [vmem:[#allocation4 + $0x30] ss:$8 sps:$4 sm:$0xff]  }
 0x22b   :  { %v353_v33 = vsub.f32 %v1234_v46, %v351_v30  ;;  %v1031_v30 = vld [vmem:[#allocation4 + $0x34] ss:$8 sps:$4 sm:$0xff]  }
 0x22d   :  { %v362_v35 = vrot.slane %v353_v33, %v361_v32  ;;  %v1034_v32 = vld [vmem:[#allocation4 + $0x24] ss:$8 sps:$4 sm:$0xff]   ;;  %v1032_v33 = vld [vmem:[#allocation4 + $0x20] ss:$8 sps:$4 sm:$0xff]  }
 0x22f   :  { %v363_v36 = vadd.f32 %v362_v35, %v358_v34  ;;  %v1037_v34 = vld [vmem:[#allocation4 + $0x14] ss:$8 sps:$4 sm:$0xff]   ;;  %v1035_v35 = vld [vmem:[#allocation4 + $0x10] ss:$8 sps:$4 sm:$0xff]  }
 0x231   :  { %v364_v37 = vmax.f32 %v363_v36, 0.0  ;;  %v1038_v36 = vld [vmem:[#allocation4] ss:$8 sps:$4 sm:$0xff]  }
 0x233   :  { %v365_v38 = vpack.c.bf16 %v364_v37, %v364_v37  ;;  %v1040_v37 = vld [vmem:[#allocation4 + $0x4] ss:$8 sps:$4 sm:$0xff]  }
 0x235   :  { %958 = vmatmul.mubr.bf16.vlgmr.msra.gmra.mxu1 %v365_v38  ;;  %v1132_v38 = vmov 0  }
 0x236   :  { %757 = vmatpush1.bf16.msra.mxu1 %v1017_v22  ;;  %788 = vmatprep.mubr.bf16.mxu1 %v1132_v38 }
 0x237   :  { %758 = vmatprep.subr.bf16.mxu1 %v1022_v23 }
 0x23a   :  { %759 = vmatpush1.bf16.msra.mxu1 %v1020_v24 }
 0x23b   :  { %760 = vmatprep.subr.bf16.mxu1 %v1025_v25 }
 0x23e   :  { %761 = vmatpush1.bf16.msra.mxu1 %v1023_v26 }
 0x23f   :  { %762 = vmatprep.subr.bf16.mxu1 %v1028_v27 }
 0x242   :  { %763 = vmatpush1.bf16.msra.mxu1 %v1026_v29  ;;  %v804_v29 = vand.u32 127, %v214_v44 }
 0x243   :  { %764 = vmatprep.subr.bf16.mxu1 %v1031_v30 }
 0x244   :  { %vm805_vm5 = vcmp.eq.s32.totalorder %v804_v29, 6 }
 0x246   :  { %765 = vmatpush1.bf16.msra.mxu1 %v1029_v31 }
 0x247   :  { %766 = vmatprep.subr.bf16.mxu1 %v1034_v32 }
 0x24a   :  { %767 = vmatpush1.bf16.msra.mxu1 %v1032_v33 }
 0x24b   :  { %768 = vmatprep.subr.bf16.mxu1 %v1037_v34 }
 0x24e   :  { %769 = vmatpush1.bf16.msra.mxu1 %v1035_v35 }
 0x24f   :  { %770 = vmatprep.subr.bf16.mxu1 %v1040_v37 }
 0x252   :  { %771 = vmatpush1.bf16.msra.mxu1 %v1038_v36 }
 0x2f5   :  { %v465_v51 = vpop.f32.mrf.mxu1 }
 0x2f6   :  { %v471_v52 = vrot.slane %v465_v51, 4 }
 0x2f7   :  { %v959_v53 = vpop.f32.mrf.mxu1 }
 0x2f8   :  { %v472_v54 = vadd.f32 %v471_v52, %v465_v51 }
 0x2f9   :  { %v468_v55 = vpop.f32.mrf.mxu1 }
 0x2fa   :  { %v473_v56 = vrot.slane %v472_v54, 2 }
 0x2fb   :  { %v960_v57 = vpop.f32.mrf.mxu1 }
 0x2fc   :  { %v474_v58 = vadd.f32 %v473_v56, %v472_v54 }
 0x2fe   :  { %v475_v59 = vrot.slane %v474_v58, 1 }
 0x300   :  { %v476_v60 = vadd.f32 %v475_v59, %v474_v58 }
 0x302   :  { %v477_v61 = vmul.f32 0.125, %v476_v60 }
 0x304   :  { %v478_v62 = vsub.f32 %v465_v51, %v477_v61 }
 0x306   :  { %v479_v63 = vmul.f32 %v478_v62, %v478_v62 }
 0x308   :  { %v480_v1 = vrot.slane %v479_v63, 4 }
 0x30a   :  { %v481_v2 = vadd.f32 %v480_v1, %v479_v63 }
 0x30c   :  { %v482_v3 = vrot.slane %v481_v2, 2 }
 0x30e   :  { %v483_v4 = vadd.f32 %v482_v3, %v481_v2  ;;  %v638_v3 = vsub.s32 3, %v1229_v45 }
 0x310   :  { %v484_v0 = vrot.slane %v483_v4, 1 }
 0x312   :  { %v485_v5 = vadd.f32 %v484_v0, %v483_v4 }
 0x314   :  { %v486_v6 = vmul.f32 0.125, %v485_v5 }
 0x316   :  { %v487_v7 = vadd.f32 1e-05, %v486_v6  ;;  %v643_v6 = vsub.s32 7, %v1229_v45  ;;  %v800_v45 = vld [vmem:[%s1291_s2] sm:$0xff] }
 0x318   :  { %1045 = vrsqrt.f32 %v487_v7 }
 0x325   :  { %v1046_v8 = vpop.eup %1045 }
 0x326   :  { %v489_v9 = vmul.f32 %v1046_v8, %v1234_v46 }
 0x328   :  { %v490_v11 = vmul.f32 %v489_v9, %v477_v61  ;;  %v498_v13 = vrot.slane %v489_v9, %v497_v10 }
 0x32a   :  { %v492_v12 = vrot.slane %v490_v11, 4  ;;  %v499_v16 = vmul.f32 %v498_v13, %v465_v51  ;;  %v664_v13 = vld [vmem:[#allocation6] sm:$0x3] }
 0x32c   :  { %v494_v15 = vsub.f32 %v1234_v46, %v492_v12 }
 0x32e   :  { %v503_v17 = vrot.slane %v494_v15, %v502_v14  ;;  %v669_v14 = vrot.slane %v664_v13, %v216_v49  ;;  %v673_v15 = vrot.slane %v664_v13, %v356_v28 }
 0x330   :  { %v504_v18 = vadd.f32 %v503_v17, %v499_v16 }
 0x332   :  { %v505_v19 = vmax.f32 %v504_v18, 0.0 }
 0x334   :  { %v506_v20 = vpack.c.bf16 %v505_v19, %v505_v19 }
 0x336   :  { %978 = vmatmul.mubr.bf16.vlgmr.msra.gmra.mxu0 %v506_v20 }
 0x3f6   :  { %v606_v39 = vpop.f32.mrf.mxu0 }
 0x3f7   :  { %v612_v40 = vrot.slane %v606_v39, 4 }
 0x3f8   :  { %v979_v41 = vpop.f32.mrf.mxu0 }
 0x3f9   :  { %v613_v42 = vadd.f32 %v612_v40, %v606_v39 }
 0x3fa   :  { %v609_v43 = vpop.f32.mrf.mxu0 }
 0x3fb   :  { %v614_v47 = vrot.slane %v613_v42, 2 }
 0x3fc   :  { %v980_v48 = vpop.f32.mrf.mxu0 }
 0x3fd   :  { %v615_v50 = vadd.f32 %v614_v47, %v613_v42 }
 0x3ff   :  { %v616_v51 = vrot.slane %v615_v50, 1 }
 0x401   :  { %v617_v52 = vadd.f32 %v616_v51, %v615_v50 }
 0x403   :  { %v618_v53 = vmul.f32 0.125, %v617_v52 }
 0x405   :  { %v619_v54 = vsub.f32 %v606_v39, %v618_v53 }
 0x407   :  { %v620_v55 = vmul.f32 %v619_v54, %v619_v54 }
 0x409   :  { %v621_v56 = vrot.slane %v620_v55, 4 }
 0x40b   :  { %v622_v57 = vadd.f32 %v621_v56, %v620_v55 }
 0x40d   :  { %v623_v58 = vrot.slane %v622_v57, 2 }
 0x40f   :  { %v624_v59 = vadd.f32 %v623_v58, %v622_v57 }
 0x411   :  { %v625_v60 = vrot.slane %v624_v59, 1 }
 0x413   :  { %v626_v61 = vadd.f32 %v625_v60, %v624_v59 }
 0x415   :  { %v627_v62 = vmul.f32 0.125, %v626_v61 }
 0x417   :  { %v628_v63 = vadd.f32 1e-05, %v627_v62 }
 0x419   :  { %1047 = vrsqrt.f32 %v628_v63 }
 0x426   :  { %v1048_v1 = vpop.eup %1047 }
 0x427   :  { %v630_v2 = vmul.f32 %v1048_v1, %v1234_v46 }
 0x429   :  { %v631_v4 = vmul.f32 %v630_v2, %v618_v53  ;;  %v639_v5 = vrot.slane %v630_v2, %v638_v3 }
 0x42b   :  { %v633_v0 = vrot.slane %v631_v4, 4  ;;  %v640_v8 = vmul.f32 %v639_v5, %v606_v39 }
 0x42d   :  { %v635_v7 = vsub.f32 %v1234_v46, %v633_v0 }
 0x42f   :  { %v644_v9 = vrot.slane %v635_v7, %v643_v6 }
 0x431   :  { %v645_v10 = vadd.f32 %v644_v9, %v640_v8 }
 0x433   :  { %v646_v11 = vmax.f32 %v645_v10, 0.0 }
 0x435   :  { %v647_v12 = vpack.c.bf16 %v646_v11, %v646_v11 }
 0x437   :  { %789 = vmatmul.mubr.bf16.vlgmr.msra.gmra.mxu1 %v647_v12 }
 0x4f7   :  { %v790_v16 = vpop.f32.mrf.mxu1 }
 0x4f8   :  { %v791_v17 = vadd.f32 %v790_v16, %v669_v14 }
 0x4f9   :  { %v792_v18 = vpop.f32.mrf.mxu1 }
 0x4fa   :  { %v873_v19 = vmul.f32 -1.442695, %v791_v17  ;;  %v793_v20 = vadd.f32 %v792_v18, %v673_v15 }
 0x4fb   :  { %v794_v21 = vpop.f32.mrf.mxu1 }
 0x4fc   :  { %1049 = vpow2.f32 %v873_v19  ;;  %v797_v46 = vmul.f32 0.5, %v793_v20  ;;  %822 = vst [vmem:[%s1298_s9 + $0x10] sm:$0xff] %v793_v20 }
 0x4fd   :  { %v795_v22 = vpop.f32.mrf.mxu1 }
 0x4fe   :  { %v798_v23 = vmul.f32 1.442695, %v797_v46 }
 0x500   :  { %1051 = vpow2.f32 %v798_v23 }
 0x509   :  { %v1050_v24 = vpop.eup %1049 }
 0x50a   :  { %v809_v49 = vadd.f32 1.0, %v1050_v24 }
 0x50c   :  { %1053 = vrcp.f32 %v809_v49 }
 0x50d   :  { %v1052_v28 = vpop.eup %1051 }
 0x50e   :  { %v801_v25 = vmul.f32 %v1052_v28, %v800_v45 }
 0x510   :  { %v802_v26 = vadd.f32 %v801_v25, %v791_v17 }
 0x512   :  { %v874_v27 = vmul.f32 -1.442695, %v802_v26 }
 0x514   :  { %1055 = vpow2.f32 %v874_v27 }
 0x519   :  { %v1054_v30 = vpop.eup %1053 }
 0x51a   :  { %v812_v31 = vsel %vm805_vm5, %v1054_v30, %v791_v17 }
 0x51b   :  { %821 = vst [vmem:[%s1298_s9 + $0x8] sm:$0xff] %v812_v31 }
 0x521   :  { %v1056_v32 = vpop.eup %1055 }
 0x522   :  { %v816_v33 = vadd.f32 1.0, %v1056_v32 }
 0x524   :  { %1057 = vrcp.f32 %v816_v33 }
 0x531   :  { %v1058_v34 = vpop.eup %1057 }
 0x532   :  { %v819_v35 = vsel %vm805_vm5, %v1058_v34, %v802_v26 }
 0x533   :  { %820 = vst [vmem:[%s1298_s9] sm:$0xff] %v819_v35 }
 0x534   :  { %827 = vsyncpa [#allocation3], 1 }
 0x535   :  { %828 = vsyncpa [#allocation5], 1 }

</bundles_post_ra>
